<compile_context>
chip_gen: v7x
topology: tpu7x:2x2x1
jax: 0.10.0
libtpu: 0.0.40
codegen_flags: <defaults>
</compile_context>

<pallas_src>
import jax
import jax.numpy as jnp
from jax.experimental import pallas as pl
from jax.experimental.pallas import tpu as pltpu


_VMEM_CAP_BYTES = 48 * 1024 * 1024   # safe on v7x's 64 MiB physical VMEM
_FAST_PATH_MACS = 1 << 20            # below this, let XLA fuse Linear+Tanh


def _round_up(x, m):
    return ((x + m - 1) // m) * m


def _mlp_kernel(x_ref, w_ref, b_ref, o_ref):
    # x_ref: (tm, Kp)  activation tile (bf16 or f32)
    # w_ref: (Kp, tn)  pre-transposed weight tile (bf16 or f32)
    # b_ref: (1,  tn)  bias tile (f32)
    # o_ref: (tm, tn)  output tile
    # Single full-K MXU contraction with f32 accumulation, then f32 epilogue
    # (bias-add on the VPU, tanh on the EUP), written once per output tile.
    acc = jnp.dot(x_ref[...], w_ref[...], preferred_element_type=jnp.float32)
    o_ref[...] = jnp.tanh(acc + b_ref[...]).astype(o_ref.dtype)


def prepare_mlp_params(weight, bias, mxu_dtype=jnp.bfloat16):
    """One-time parameter prep, amortized outside the per-call hot path.

    weight: (H_out, H_in) in PyTorch nn.Linear layout; bias: (H_out,).
    Transposes to (H_in, H_out), zero-pads to 128-multiples, and casts the
    weight to the MXU operand dtype (bf16 by default) ONCE.
    Returns (w_prepared, bias2d, (H_out, H_in)).
    """
    H_out, H_in = weight.shape
    Kp = _round_up(H_in, 128)
    Np = _round_up(H_out, 128)

    w_t = weight.T                                      # (H_in, H_out)
    if (Kp, Np) != (H_in, H_out):
        w_t = jnp.pad(w_t, ((0, Kp - H_in), (0, Np - H_out)))
    if mxu_dtype is not None:
        w_t = w_t.astype(mxu_dtype)

    b = bias
    if Np != H_out:
        b = jnp.pad(b, (0, Np - H_out))
    b2d = b.reshape(1, Np).astype(jnp.float32)
    return w_t, b2d, (H_out, H_in)


def _pick_tiles(Bp, Np, Kp, x_bytes, w_bytes, out_bytes):
    """Pick (tm, tn, vmem_limit): lane-dense, exactly dividing, VMEM-safe, and
    (when possible) an even number of parallel blocks for the v7x megacore."""
    # tm: whole (16-padded) batch if small, else the largest 16-multiple divisor.
    if Bp <= 256:
        tm = Bp
    else:
        tm = next(c for c in (256, 128, 64, 32, 16) if Bp % c == 0)
    # tn: largest 128-multiple dividing Np (Np is itself a 128-multiple).
    tn = next(c for c in (512, 384, 256, 128) if Np % c == 0)

    def vmem_estimate(tm_, tn_):
        # Double-buffered x / W / out tiles plus the (tiny) bias tile.
        return 2 * (tm_ * Kp * x_bytes + Kp * tn_ * w_bytes
                    + tm_ * tn_ * out_bytes) + 2 * tn_ * 4

    # Shrink (rarely needed at MLP-head sizes) if we'd blow the v7x budget.
    if vmem_estimate(tm, tn) > _VMEM_CAP_BYTES:
        tn = 128
    while vmem_estimate(tm, tn) > _VMEM_CAP_BYTES and tm > 16:
        tm = max(16, tm // 2)

    # v7x 2-TC balance: avoid an odd number (>1) of parallel blocks.
    blocks = (Bp // tm) * (Np // tn)
    if blocks > 1 and blocks % 2 == 1:
        if tn > 128 and Np % (tn // 2) == 0 and \
                vmem_estimate(tm, tn // 2) <= _VMEM_CAP_BYTES:
            tn //= 2
        elif tm > 16 and (tm // 2) % 16 == 0 and Bp % (tm // 2) == 0:
            tm //= 2

    vmem_limit = min(max(vmem_estimate(tm, tn) + (8 << 20), 32 << 20),
                     _VMEM_CAP_BYTES)
    return tm, tn, vmem_limit


def mlp_layer_prepared(features, w_prepared, bias2d, orig_dims, *,
                       mxu_dtype=jnp.bfloat16):
    """Hot-path entry: params already transposed/padded/cast by prepare_mlp_params."""
    H_out, H_in = orig_dims
    B, H_in_x = features.shape
    assert H_in_x == H_in, (features.shape, orig_dims)
    Kp, Np = w_prepared.shape
    Bp = _round_up(B, 16)

    x = features
    if mxu_dtype is not None and x.dtype != mxu_dtype:
        x = x.astype(mxu_dtype)
    if (Bp, Kp) != x.shape:
        # Only the (small) activation ever gets a per-call pad; W/bias are pre-padded.
        x = jnp.pad(x, ((0, Bp - B), (0, Kp - H_in)))

    out_dtype = features.dtype
    tm, tn, vmem_limit = _pick_tiles(
        Bp, Np, Kp,
        x.dtype.itemsize, w_prepared.dtype.itemsize, jnp.dtype(out_dtype).itemsize)

    grid = (Bp // tm, Np // tn)

    out = pl.pallas_call(
        _mlp_kernel,
        out_shape=jax.ShapeDtypeStruct((Bp, Np), out_dtype),
        grid_spec=pltpu.PrefetchScalarGridSpec(
            num_scalar_prefetch=0,
            grid=grid,
            in_specs=[
                pl.BlockSpec((tm, Kp), lambda i, j: (i, 0)),   # x tile (full K)
                pl.BlockSpec((Kp, tn), lambda i, j: (0, j)),   # W tile (K, N)
                pl.BlockSpec((1, tn), lambda i, j: (0, j)),    # bias tile
            ],
            out_specs=pl.BlockSpec((tm, tn), lambda i, j: (i, j)),
        ),
        compiler_params=pltpu.CompilerParams(
            dimension_semantics=("parallel", "parallel"),
            vmem_limit_bytes=vmem_limit,
        ),
    )(x, w_prepared, bias2d)

    if (Bp, Np) != (B, H_out):
        out = out[:B, :H_out]
    return out


def mlp_layer(features, weight, bias, *, mxu_dtype=jnp.bfloat16,
              force_pallas=False):
    """features: (B, H_in); weight: (H_out, H_in) [PyTorch layout]; bias: (H_out,).

    mxu_dtype casts the MXU operands (default bf16 — roughly halves W HBM bytes
    on this memory-bound op); accumulation, bias-add and tanh stay f32, so
    expect ~sqrt(H_in)*eps_bf16 error vs an f32 reference. Pass mxu_dtype=None
    for a pure-f32 path. For repeated calls, call prepare_mlp_params once and
    use mlp_layer_prepared directly.
    """
    B, H_in = features.shape
    H_out = weight.shape[0]
    if not force_pallas and B * H_in * H_out < _FAST_PATH_MACS:
        # Tiny-shape fast path: a standalone kernel is pure launch + padding
        # overhead here; let XLA fuse Linear+Tanh.
        return jnp.tanh(features @ weight.T + bias).astype(features.dtype)

    w_prepared, bias2d, dims = prepare_mlp_params(weight, bias, mxu_dtype)
    return mlp_layer_prepared(features, w_prepared, bias2d, dims,
                              mxu_dtype=mxu_dtype)


if __name__ == "__main__":
    key = jax.random.PRNGKey(0)
    k_x, k_w, k_b, k_x2, k_w2, k_b2 = jax.random.split(key, 6)

    # --- Small module-consistent shapes: batch=8 CLS vectors, hidden=32 ---
    B, H = 8, 32
    features = jax.random.normal(k_x, (B, H), dtype=jnp.float32)
    weight = jax.random.normal(k_w, (H, H), dtype=jnp.float32) * 0.02   # (out, in)
    bias = jax.random.normal(k_b, (H,), dtype=jnp.float32) * 0.02
    ref = jnp.tanh(features @ weight.T + bias)

    # Force the Pallas kernel (f32 operands) and check tightly.
    out = jax.block_until_ready(
        mlp_layer(features, weight, bias, mxu_dtype=None, force_pallas=True))
    assert out.shape == (B, H)
    assert jnp.allclose(out, ref, atol=1e-5, rtol=1e-5), "f32 small-shape mismatch"

    # Auto path (tiny shape -> fused XLA fast path).
    out_auto = jax.block_until_ready(mlp_layer(features, weight, bias))
    assert jnp.allclose(out_auto, ref, atol=1e-5, rtol=1e-5), "fast-path mismatch"

    # --- BERT-like shapes to exercise the tiled 2-D all-parallel grid ---
    B2, H2 = 256, 768
    features2 = jax.random.normal(k_x2, (B2, H2), dtype=jnp.float32)
    weight2 = jax.random.normal(k_w2, (H2, H2), dtype=jnp.float32) * 0.02
    bias2 = jax.random.normal(k_b2, (H2,), dtype=jnp.float32) * 0.02
    ref2 = jnp.tanh(features2 @ weight2.T + bias2)

    # f32 operand path (prepared once, run via the hot-path entry).
    w_f32, b2d_f32, dims2 = prepare_mlp_params(weight2, bias2, mxu_dtype=None)
    out2_f32 = jax.block_until_ready(
        mlp_layer_prepared(features2, w_f32, b2d_f32, dims2, mxu_dtype=None))
    assert out2_f32.shape == (B2, H2)
    assert jnp.allclose(out2_f32, ref2, atol=1e-3, rtol=1e-3), "f32 tiled mismatch"

    # Default bf16-operand path (weight cast/pad/transpose done once in prep).
    w_bf16, b2d, _ = prepare_mlp_params(weight2, bias2)   # bf16 default
    out2_bf16 = jax.block_until_ready(
        mlp_layer_prepared(features2, w_bf16, b2d, dims2))
    assert jnp.allclose(out2_bf16, ref2, atol=2e-2, rtol=2e-2), "bf16 path mismatch"

    print("KERNEL_OK")
</pallas_src>

<mosaic_0001>
module attributes {stable_mosaic.version = 11 : i64} {
  func.func @_mlp_kernel(%arg0: i32, %arg1: i32, %arg2: memref<16x128xf32, #tpu.memory_space<vmem>>, %arg3: memref<128x128xf32, #tpu.memory_space<vmem>>, %arg4: memref<1x128xf32, #tpu.memory_space<vmem>>, %arg5: memref<16x128xf32, #tpu.memory_space<vmem>>) attributes {dimension_semantics = [#tpu.dimension_semantics<parallel>, #tpu.dimension_semantics<parallel>], iteration_bounds = array<i64: 1, 1>, scalar_prefetch = 0 : i64, scratch_operands = 0 : i64, tpu.core_type = #tpu.core_type<tc>, window_params = [{transform_indices = @transform_0, window_bounds = array<i64: 16, 128>}, {transform_indices = @transform_1, window_bounds = array<i64: 128, 128>}, {transform_indices = @transform_2, window_bounds = array<i64: 1, 128>}, {transform_indices = @transform_3, window_bounds = array<i64: 16, 128>}]} {
    %c0 = arith.constant 0 : index
    %c0_0 = arith.constant 0 : index
    %0 = vector.load %arg2[%c0, %c0_0] : memref<16x128xf32, #tpu.memory_space<vmem>>, vector<16x128xf32>
    %c0_1 = arith.constant 0 : index
    %c0_2 = arith.constant 0 : index
    %1 = vector.load %arg3[%c0_1, %c0_2] : memref<128x128xf32, #tpu.memory_space<vmem>>, vector<128x128xf32>
    %cst = arith.constant dense<0.000000e+00> : vector<16x128xf32>
    %2 = tpu.matmul %0, %1, %cst {dimension_numbers = #tpu.dot_dimension_numbers<[1], [0], [0], [1], [0, 0, 1, 1], [], []>} : vector<16x128xf32>, vector<128x128xf32>, vector<16x128xf32> -> vector<16x128xf32>
    %c0_3 = arith.constant 0 : index
    %c0_4 = arith.constant 0 : index
    %3 = vector.load %arg4[%c0_3, %c0_4] : memref<1x128xf32, #tpu.memory_space<vmem>>, vector<1x128xf32>
    %4 = vector.broadcast %3 : vector<1x128xf32> to vector<16x128xf32>
    %5 = arith.addf %2, %4 : vector<16x128xf32>
    %6 = math.tanh %5 : vector<16x128xf32>
    %c0_5 = arith.constant 0 : index
    %c0_6 = arith.constant 0 : index
    %7 = vector.load %arg5[%c0_5, %c0_6] : memref<16x128xf32, #tpu.memory_space<vmem>>, vector<16x128xf32>
    tpu.vector_store %arg5[%c0_5, %c0_6], %6 {strides = array<i32>} : memref<16x128xf32, #tpu.memory_space<vmem>>, vector<16x128xf32>,
    return
  }
  func.func @transform_0(%arg0: i32, %arg1: i32) -> (i32, i32) {
    %c0_i32 = arith.constant 0 : i32
    %c0_i32_0 = arith.constant 0 : i32
    return %arg0, %c0_i32 : i32, i32
  }
  func.func @transform_1(%arg0: i32, %arg1: i32) -> (i32, i32) {
    %c0_i32 = arith.constant 0 : i32
    %c0_i32_0 = arith.constant 0 : i32
    return %c0_i32, %arg1 : i32, i32
  }
  func.func @transform_2(%arg0: i32, %arg1: i32) -> (i32, i32) {
    %c0_i32 = arith.constant 0 : i32
    %c0_i32_0 = arith.constant 0 : i32
    return %c0_i32, %arg1 : i32, i32
  }
  func.func @transform_3(%arg0: i32, %arg1: i32) -> (i32, i32) {
    %c0_i32 = arith.constant 0 : i32
    return %arg0, %arg1 : i32, i32
  }
}

</mosaic_0001>

<bundles_post_ra>
// kernel: tpu_custom_call.1
= control target key start
LH: loop header
LB: loop body
LE: loop exit
PB: predicated region body
PF: predicated region fallthrough
CT: control target
= control target key end

     0   :  { %8 = vsyncpa [#allocation3], 0  ;;  %s405_s0 = inlined_call_operand.hbm [shape: f32[16,128], index: 0, kind: input, shape index: {}]   ;;  %s406_s1 = inlined_call_operand.hbm [shape: f32[128,128], index: 1, kind: input, shape index: {}]   ;;  %s407_s2 = inlined_call_operand.vmem [shape: f32[1,128], index: 2, kind: input, shape index: {}]   ;;  %s408_s3 = inlined_call_operand.hbm [shape: f32[16,128], index: 3, kind: output, shape index: {}]  }
   0x1   :  { %9 = vsyncpa [#allocation6], 0 }
   0x2   :  { %10 = vsyncpa [#allocation4], 0  ;;  %s332_s12 = smov [#allocation2]   ;;  %s260_s16 = scalar_lea.hbm %s405_s0, 256 }
   0x3   :  { %s16_s13 = sshll.u32 %s332_s12, 4  ;;  %p261_p0 = scmp.ne.s32.totalorder %s405_s0, %s260_s16  ;;  %s17_s13 = int_to_ptr.vmem [resolvable:$true] %s16_s13 }
   0x4   :  { %p264_p1 = scmp.lt.u32.totalorder %s260_s16, %s405_s0 }
   0x6   :  { %p266_p2 = pnand %p264_p1, %p261_p0 }
   0x8   :  { %269 = shalt.err (!%p266_p2)
}
   0x9   :  { %s270_s21 = scalar_lea.vmem %s17_s13, 256  ;;  %p275_p4 = scmp.lt.s32.totalorder %s17_s13, %s17_s13 }
   0xa   :  { %p271_p3 = scmp.ne.s32.totalorder %s17_s13, %s270_s21  ;;  %p276_p5 = scmp.lt.s32.totalorder %s270_s21, %s270_s21 }
   0xc   :  { %p277_p6 = por %p276_p5, %p275_p4 }
   0xe   :  { %p278_p7 = pnand %p277_p6, %p271_p3 }
  0x10   :  { %281 = shalt.err (!%p278_p7)
}
  0x11   :  { %s333_s22 = smov 128   ;;  %s334_s23 = smov 8  }
  0x12   :  { %22 = dma.hbm_to_vmem [thread:$0]  %s405_s0, 256, %s17_s13, [#allocation3], %s333_s22, %s333_s22, %s334_s23  }
  0x13   :  { %s335_s26 = smov [#allocation5]   ;;  %s282_s30 = scalar_lea.hbm %s406_s1, 2048 }
  0x14   :  { %s28_s27 = sshll.u32 %s335_s26, 4  ;;  %p283_p8 = scmp.ne.s32.totalorder %s406_s1, %s282_s30  ;;  %s29_s27 = int_to_ptr.vmem [resolvable:$true] %s28_s27 }
  0x15   :  { %p286_p9 = scmp.lt.u32.totalorder %s282_s30, %s406_s1 }
  0x17   :  { %p288_p10 = pnand %p286_p9, %p283_p8 }
  0x19   :  { %291 = shalt.err (!%p288_p10)
}
  0x1a   :  { %s292_s8 = scalar_lea.vmem %s29_s27, 2048  ;;  %p297_p12 = scmp.lt.s32.totalorder %s29_s27, %s29_s27 }
  0x1b   :  { %p293_p11 = scmp.ne.s32.totalorder %s29_s27, %s292_s8  ;;  %p298_p13 = scmp.lt.s32.totalorder %s292_s8, %s292_s8 }
  0x1d   :  { %p299_p0 = por %p298_p13, %p297_p12 }
  0x1f   :  { %p300_p1 = pnand %p299_p0, %p293_p11 }
  0x21   :  { %303 = shalt.err (!%p300_p1)
}
  0x22   :  { %34 = dma.hbm_to_vmem [thread:$0]  %s406_s1, 2048, %s29_s27, [#allocation6], %s333_s22, %s333_s22, %s334_s23  }
  0x23   :  { %326 = dma.done.wait [#allocation3], 256  }
  0x24   :  { %327 = vsyncadd [#allocation3], 4294967040 }
  0x25   :  { %328 = dma.done.wait [#allocation6], 2048  }
  0x26   :  { %329 = vsyncadd [#allocation6], 4294965248  ;;  %v45_v0 = vld [vmem:[#allocation5] sm:$0xff]  ;;  %v46_v1 = vld [vmem:[#allocation5 + $0x8] sm:$0xff]  ;;  %s336_s11 = smov [#allocation7]  }
  0x27   :  { %v47_v2 = vld [vmem:[#allocation5 + $0x10] sm:$0xff]  ;;  %v219_v3 = vpack.c.bf16 %v46_v1, %v45_v0  ;;  %v48_v4 = vld [vmem:[#allocation5 + $0x18] sm:$0xff]  ;;  %v49_v6 = vld [vmem:[#allocation5 + $0x20] sm:$0xff]  ;;  %s152_s12 = sshll.u32 %s336_s11, 4  ;;  %s153_s12 = int_to_ptr.vmem [resolvable:$true] %s152_s12 }
  0x28   :  { %v223_v5 = vpack.c.bf16 %v48_v4, %v47_v2  ;;  %v50_v7 = vld [vmem:[#allocation5 + $0x28] sm:$0xff]  ;;  %v43_v9 = vld [vmem:[#allocation2] sm:$0xff]  ;;  %v52_v11 = vld [vmem:[#allocation5 + $0x38] sm:$0xff]  ;;  %s304_s13 = scalar_lea.vmem %s153_s12, 256  ;;  %p309_p3 = scmp.lt.s32.totalorder %s153_s12, %s153_s12 }
  0x29   :  { %220 = vmatprep.subr.bf16.mxu0 %v219_v3  ;;  %v227_v8 = vpack.c.bf16 %v50_v7, %v49_v6  ;;  %v51_v10 = vld [vmem:[#allocation5 + $0x30] sm:$0xff]  ;;  %216 = vmatprep.mubr.f32.mxu0 %v43_v9  ;;  %v53_v13 = vld [vmem:[#allocation5 + $0x40] sm:$0xff]  ;;  %v54_v14 = vld [vmem:[#allocation5 + $0x48] sm:$0xff]  ;;  %p305_p2 = scmp.ne.s32.totalorder %s153_s12, %s304_s13  ;;  %p310_p4 = scmp.lt.s32.totalorder %s304_s13, %s304_s13 }
  0x2a   :  { %222 = vmatpush3.bf16.msra.mxu0 %v219_v3  ;;  %v231_v12 = vpack.c.bf16 %v52_v11, %v51_v10  ;;  %v235_v15 = vpack.c.bf16 %v54_v14, %v53_v13  ;;  %v55_v16 = vld [vmem:[#allocation5 + $0x50] sm:$0xff]  ;;  %v56_v17 = vld [vmem:[#allocation5 + $0x58] sm:$0xff]  ;;  %v57_v19 = vld [vmem:[#allocation5 + $0x60] sm:$0xff] }
  0x2b   :  { %224 = vmatprep.subr.bf16.mxu0 %v223_v5  ;;  %v239_v18 = vpack.c.bf16 %v56_v17, %v55_v16  ;;  %v58_v20 = vld [vmem:[#allocation5 + $0x68] sm:$0xff]  ;;  %v59_v22 = vld [vmem:[#allocation5 + $0x70] sm:$0xff]  ;;  %v60_v23 = vld [vmem:[#allocation5 + $0x78] sm:$0xff]  ;;  %p311_p5 = por %p310_p4, %p309_p3 }
  0x2c   :  { %v243_v21 = vpack.c.bf16 %v58_v20, %v57_v19  ;;  %v247_v24 = vpack.c.bf16 %v60_v23, %v59_v22  ;;  %v44_v25 = vld [vmem:[#allocation2 + $0x8] sm:$0xff]  ;;  %v165_v26 = vld [vmem:[%s407_s2] ss:$0 sm:$0xff] }
  0x2d   :  { %p312_p6 = pnand %p311_p5, %p305_p2 }
  0x2e   :  { %226 = vmatpush3.bf16.msra.mxu0 %v223_v5 }
  0x2f   :  { %228 = vmatprep.subr.bf16.mxu0 %v227_v8 }
  0x32   :  { %230 = vmatpush3.bf16.msra.mxu0 %v227_v8 }
  0x33   :  { %232 = vmatprep.subr.bf16.mxu0 %v231_v12 }
  0x36   :  { %234 = vmatpush3.bf16.msra.mxu0 %v231_v12 }
  0x37   :  { %236 = vmatprep.subr.bf16.mxu0 %v235_v15 }
  0x3a   :  { %238 = vmatpush3.bf16.msra.mxu0 %v235_v15 }
  0x3b   :  { %240 = vmatprep.subr.bf16.mxu0 %v239_v18 }
  0x3e   :  { %242 = vmatpush3.bf16.msra.mxu0 %v239_v18 }
  0x3f   :  { %244 = vmatprep.subr.bf16.mxu0 %v243_v21 }
  0x42   :  { %246 = vmatpush3.bf16.msra.mxu0 %v243_v21 }
  0x43   :  { %248 = vmatprep.subr.bf16.mxu0 %v247_v24 }
  0x46   :  { %250 = vmatpush3.bf16.msra.mxu0 %v247_v24 }
  0x49   :  { %217 = vmatmul.mubr.f32.vlgmr.msra.gmra.mrb[0].mxu0 %v44_v25 }
 0x11c   :  { %v218_v27 = vpop.f32.mrb[0].mxu0 }
 0x11d   :  { %v140_v28 = vadd.f32 %v218_v27, %v165_v26  ;;  %v134_v29 = vpop.f32.mrb[1].mxu0 }
 0x11e   :  { %v135_v30 = vadd.f32 %v165_v26, %v134_v29 }
 0x11f   :  { %256 = vtanh.f32 %v140_v28 }
 0x120   :  { %258 = vtanh.f32 %v135_v30 }
 0x129   :  { %v257_v31 = vpop.eup %256 }
 0x12a   :  { %v259_v32 = vpop.eup %258  ;;  %146 = vst [vmem:[#allocation7 + $0x8] sm:$0xff] %v257_v31 }
 0x12b   :  { %145 = vst [vmem:[#allocation7] sm:$0xff] %v259_v32 }
 0x12c   :  { %315 = shalt.err (!%p312_p6)
}
 0x12d   :  { %s316_s15 = scalar_lea.hbm %s408_s3, 256 }
 0x12e   :  { %p317_p7 = scmp.ne.s32.totalorder %s408_s3, %s316_s15  ;;  %p320_p8 = scmp.lt.u32.totalorder %s316_s15, %s408_s3 }
 0x130   :  { %p322_p9 = pnand %p320_p8, %p317_p7 }
 0x132   :  { %325 = shalt.err (!%p322_p9)
}
 0x133   :  { %158 = dma.vmem_to_hbm [thread:$0]  %s153_s12, 256, %s408_s3, [#allocation4], %s333_s22, %s333_s22, %s334_s23  }
 0x134   :  { %330 = dma.done.wait [#allocation4], 256  }
 0x135   :  { %331 = vsyncadd [#allocation4], 4294967040 }
 0x136   :  { %162 = vsyncpa [#allocation3], 1 }
 0x137   :  { %163 = vsyncpa [#allocation6], 1 }
 0x138   :  { %164 = vsyncpa [#allocation4], 1 }

</bundles_post_ra>
